<compile_context>
chip_gen: v7x
topology: tpu7x:2x2x1
jax: 0.10.0
libtpu: 0.0.40
codegen_flags: <defaults>
</compile_context>

<pallas_src>
import jax
import jax.numpy as jnp
from jax.experimental import pallas as pl
from jax.experimental.pallas import tpu as pltpu


def se_kernel(x_ref, w1_ref, b1_ref, w2_ref, b2_ref, o_ref):
    # x_ref block: (1, C, HW) -- one batch element per grid step; channels on
    # sublanes, spatial positions on lanes (native NCHW memory order).
    x = x_ref[0]                                              # (C, HW)
    xf = x.astype(jnp.float32)

    # Squeeze: global average pool over spatial positions (f32 accumulation).
    mean_col = jnp.mean(xf, axis=1, keepdims=True)            # (C, 1)

    # fc1 (1x1 conv) + SiLU on the per-channel column.
    s1 = jnp.dot(w1_ref[...], mean_col,
                 preferred_element_type=jnp.float32) + b1_ref[...]   # (S, 1)
    s1 = s1 * jax.nn.sigmoid(s1)                              # SiLU

    # fc2 (1x1 conv) + Sigmoid -> per-channel scale column.
    s2 = jnp.dot(w2_ref[...], s1,
                 preferred_element_type=jnp.float32) + b2_ref[...]   # (C, 1)
    scale = jax.nn.sigmoid(s2)                                # (C, 1)

    # Excite: broadcast the per-channel scale over all spatial lanes.
    o_ref[0] = (xf * scale).astype(o_ref.dtype)


def squeeze_excitation(x_nchw, w1, b1, w2, b2):
    """x_nchw: (N, C_expand, H, W); w1: (S, C_expand); b1: (S,);
    w2: (C_expand, S); b2: (C_expand,). Returns (N, C_expand, H, W)."""
    N, C, H, W = x_nchw.shape
    S = w1.shape[0]
    HW = H * W

    # Free view: NCHW is contiguous, so (N, C, H, W) -> (N, C, H*W) moves no data.
    x = x_nchw.reshape(N, C, HW)
    w1f = w1.astype(jnp.float32)              # (S, C)
    w2f = w2.astype(jnp.float32)              # (C, S)
    b1c = b1.reshape(S, 1).astype(jnp.float32)
    b2c = b2.reshape(C, 1).astype(jnp.float32)

    # Explicit VMEM budget: in + out double-buffered blocks + weights + slack.
    block_bytes = C * HW * x.dtype.itemsize
    weight_bytes = (w1f.size + w2f.size + b1c.size + b2c.size) * 4
    vmem_limit = 4 * block_bytes + 2 * weight_bytes + (2 << 20)
    vmem_limit = min(max(vmem_limit, 16 << 20), 64 << 20)   # cap: v7x VMEM = 64 MiB
    # TODO(synk): for very large SE layers (C*HW f32 block > ~14 MiB) switch to an
    # HW-tiled two-pass (accumulate-sum then scale) kernel instead of keeping one
    # resident (C, HW) block per batch element.

    out = pl.pallas_call(
        se_kernel,
        out_shape=jax.ShapeDtypeStruct((N, C, HW), x.dtype),
        grid_spec=pltpu.PrefetchScalarGridSpec(
            num_scalar_prefetch=0,
            grid=(N,),
            in_specs=[
                pl.BlockSpec((1, C, HW), lambda n: (n, 0, 0)),
                pl.BlockSpec((S, C), lambda n: (0, 0)),
                pl.BlockSpec((S, 1), lambda n: (0, 0)),
                pl.BlockSpec((C, S), lambda n: (0, 0)),
                pl.BlockSpec((C, 1), lambda n: (0, 0)),
            ],
            out_specs=pl.BlockSpec((1, C, HW), lambda n: (n, 0, 0)),
        ),
        compiler_params=pltpu.CompilerParams(
            dimension_semantics=("parallel",),
            vmem_limit_bytes=vmem_limit,
        ),
    )(x, w1f, b1c, w2f, b2c)

    # Free view back to NCHW.
    return out.reshape(N, C, H, W)


def reference(x_nchw, w1, b1, w2, b2):
    scale = jnp.mean(x_nchw, axis=(2, 3), keepdims=True)          # (N, C, 1, 1)
    s = jnp.einsum('nchw,sc->nshw', scale, w1) + b1[None, :, None, None]
    s = s * jax.nn.sigmoid(s)
    s = jnp.einsum('nshw,cs->nchw', s, w2) + b2[None, :, None, None]
    s = jax.nn.sigmoid(s)
    return s * x_nchw


if __name__ == "__main__":
    # Module config: input_channel=32, expand_channel=128, se_ratio=0.25 -> S=8
    input_channel = 32
    expand_channel = 128
    squeeze_channel = int(input_channel * 0.25)   # 8

    N, H, W = 2, 16, 16                           # HW = 256 (lane-dense output)

    key = jax.random.PRNGKey(0)
    k_x, k_w1, k_b1, k_w2, k_b2 = jax.random.split(key, 5)

    x = jax.random.normal(k_x, (N, expand_channel, H, W), dtype=jnp.float32)
    # fc1: Conv2d(expand_channel, squeeze_channel, 1) -> weight (S, C_expand)
    w1 = jax.random.normal(k_w1, (squeeze_channel, expand_channel), jnp.float32) * 0.1
    b1 = jax.random.normal(k_b1, (squeeze_channel,), jnp.float32) * 0.1
    # fc2: Conv2d(squeeze_channel, expand_channel, 1) -> weight (C_expand, S)
    w2 = jax.random.normal(k_w2, (expand_channel, squeeze_channel), jnp.float32) * 0.1
    b2 = jax.random.normal(k_b2, (expand_channel,), jnp.float32) * 0.1

    out = squeeze_excitation(x, w1, b1, w2, b2)
    out = jax.block_until_ready(out)

    ref = reference(x, w1, b1, w2, b2)
    assert out.shape == x.shape
    assert jnp.allclose(out, ref, atol=1e-5, rtol=1e-5), "mismatch vs reference"

    print("KERNEL_OK")
</pallas_src>

<mosaic_0001>
module attributes {stable_mosaic.version = 11 : i64} {
  func.func @se_kernel(%arg0: i32, %arg1: memref<1x128x256xf32, #tpu.memory_space<vmem>>, %arg2: memref<8x128xf32, #tpu.memory_space<vmem>>, %arg3: memref<8x1xf32, #tpu.memory_space<vmem>>, %arg4: memref<128x8xf32, #tpu.memory_space<vmem>>, %arg5: memref<128x1xf32, #tpu.memory_space<vmem>>, %arg6: memref<1x128x256xf32, #tpu.memory_space<vmem>>) attributes {dimension_semantics = [#tpu.dimension_semantics<parallel>], iteration_bounds = array<i64: 2>, scalar_prefetch = 0 : i64, scratch_operands = 0 : i64, tpu.core_type = #tpu.core_type<tc>, window_params = [{transform_indices = @transform_0, window_bounds = array<i64: 1, 128, 256>}, {pipeline_mode = #tpu.pipeline_mode<synchronous>, transform_indices = @transform_1, window_bounds = array<i64: 8, 128>}, {pipeline_mode = #tpu.pipeline_mode<synchronous>, transform_indices = @transform_2, window_bounds = array<i64: 8, 1>}, {pipeline_mode = #tpu.pipeline_mode<synchronous>, transform_indices = @transform_3, window_bounds = array<i64: 128, 8>}, {pipeline_mode = #tpu.pipeline_mode<synchronous>, transform_indices = @transform_4, window_bounds = array<i64: 128, 1>}, {transform_indices = @transform_5, window_bounds = array<i64: 1, 128, 256>}]} {
    %c0 = arith.constant 0 : index
    %c0_0 = arith.constant 0 : index
    %c0_1 = arith.constant 0 : index
    %0 = vector.load %arg1[%c0, %c0_0, %c0_1] : memref<1x128x256xf32, #tpu.memory_space<vmem>>, vector<1x128x256xf32>
    %1 = vector.shape_cast %0 : vector<1x128x256xf32> to vector<128x256xf32>
    %cst = arith.constant dense<0.000000e+00> : vector<128xf32>
    %2 = vector.multi_reduction <add>, %1, %cst [1] : vector<128x256xf32> to vector<128xf32>
    %3 = vector.shape_cast %2 : vector<128xf32> to vector<128x1xf32>
    %cst_2 = arith.constant 2.560000e+02 : f32
    %4 = vector.broadcast %cst_2 : f32 to vector<128x1xf32>
    %5 = arith.divf %3, %4 : vector<128x1xf32>
    %c0_3 = arith.constant 0 : index
    %c0_4 = arith.constant 0 : index
    %6 = vector.load %arg2[%c0_3, %c0_4] : memref<8x128xf32, #tpu.memory_space<vmem>>, vector<8x128xf32>
    %cst_5 = arith.constant dense<0.000000e+00> : vector<8x1xf32>
    %7 = tpu.matmul %6, %5, %cst_5 {dimension_numbers = #tpu.dot_dimension_numbers<[1], [0], [0], [1], [0, 0, 1, 1], [], []>} : vector<8x128xf32>, vector<128x1xf32>, vector<8x1xf32> -> vector<8x1xf32>
    %c0_6 = arith.constant 0 : index
    %c0_7 = arith.constant 0 : index
    %8 = vector.load %arg3[%c0_6, %c0_7] : memref<8x1xf32, #tpu.memory_space<vmem>>, vector<8x1xf32>
    %9 = arith.addf %7, %8 : vector<8x1xf32>
    %10 = arith.negf %9 : vector<8x1xf32>
    %11 = math.exp %10 : vector<8x1xf32>
    %cst_8 = arith.constant 1.000000e+00 : f32
    %12 = vector.broadcast %cst_8 : f32 to vector<8x1xf32>
    %13 = arith.addf %12, %11 : vector<8x1xf32>
    %14 = arith.divf %12, %13 : vector<8x1xf32>
    %15 = arith.mulf %9, %14 : vector<8x1xf32>
    %c0_9 = arith.constant 0 : index
    %c0_10 = arith.constant 0 : index
    %16 = vector.load %arg4[%c0_9, %c0_10] : memref<128x8xf32, #tpu.memory_space<vmem>>, vector<128x8xf32>
    %cst_11 = arith.constant dense<0.000000e+00> : vector<128x1xf32>
    %17 = tpu.matmul %16, %15, %cst_11 {dimension_numbers = #tpu.dot_dimension_numbers<[1], [0], [0], [1], [0, 0, 1, 1], [], []>} : vector<128x8xf32>, vector<8x1xf32>, vector<128x1xf32> -> vector<128x1xf32>
    %c0_12 = arith.constant 0 : index
    %c0_13 = arith.constant 0 : index
    %18 = vector.load %arg5[%c0_12, %c0_13] : memref<128x1xf32, #tpu.memory_space<vmem>>, vector<128x1xf32>
    %19 = arith.addf %17, %18 : vector<128x1xf32>
    %20 = arith.negf %19 : vector<128x1xf32>
    %21 = math.exp %20 : vector<128x1xf32>
    %cst_14 = arith.constant 1.000000e+00 : f32
    %22 = vector.broadcast %cst_14 : f32 to vector<128x1xf32>
    %23 = arith.addf %22, %21 : vector<128x1xf32>
    %24 = arith.divf %22, %23 : vector<128x1xf32>
    %25 = vector.broadcast %24 : vector<128x1xf32> to vector<128x256xf32>
    %26 = arith.mulf %1, %25 : vector<128x256xf32>
    %c0_15 = arith.constant 0 : index
    %c0_16 = arith.constant 0 : index
    %c0_17 = arith.constant 0 : index
    %27 = vector.load %arg6[%c0_15, %c0_16, %c0_17] : memref<1x128x256xf32, #tpu.memory_space<vmem>>, vector<1x128x256xf32>
    %28 = vector.shape_cast %27 : vector<1x128x256xf32> to vector<128x256xf32>
    %29 = vector.shape_cast %26 : vector<128x256xf32> to vector<1x128x256xf32>
    tpu.vector_store %arg6[%c0_15, %c0_16, %c0_17], %29 {strides = array<i32>} : memref<1x128x256xf32, #tpu.memory_space<vmem>>, vector<1x128x256xf32>,
    return
  }
  func.func @transform_0(%arg0: i32) -> (i32, i32, i32) {
    %c0_i32 = arith.constant 0 : i32
    %c0_i32_0 = arith.constant 0 : i32
    %c0_i32_1 = arith.constant 0 : i32
    return %arg0, %c0_i32, %c0_i32_0 : i32, i32, i32
  }
  func.func @transform_1(%arg0: i32) -> (i32, i32) {
    %c0_i32 = arith.constant 0 : i32
    %c0_i32_0 = arith.constant 0 : i32
    %c0_i32_1 = arith.constant 0 : i32
    return %c0_i32, %c0_i32_0 : i32, i32
  }
  func.func @transform_2(%arg0: i32) -> (i32, i32) {
    %c0_i32 = arith.constant 0 : i32
    %c0_i32_0 = arith.constant 0 : i32
    %c0_i32_1 = arith.constant 0 : i32
    return %c0_i32, %c0_i32_0 : i32, i32
  }
  func.func @transform_3(%arg0: i32) -> (i32, i32) {
    %c0_i32 = arith.constant 0 : i32
    %c0_i32_0 = arith.constant 0 : i32
    %c0_i32_1 = arith.constant 0 : i32
    return %c0_i32, %c0_i32_0 : i32, i32
  }
  func.func @transform_4(%arg0: i32) -> (i32, i32) {
    %c0_i32 = arith.constant 0 : i32
    %c0_i32_0 = arith.constant 0 : i32
    %c0_i32_1 = arith.constant 0 : i32
    return %c0_i32, %c0_i32_0 : i32, i32
  }
  func.func @transform_5(%arg0: i32) -> (i32, i32, i32) {
    %c0_i32 = arith.constant 0 : i32
    %c0_i32_0 = arith.constant 0 : i32
    %c0_i32_1 = arith.constant 0 : i32
    return %arg0, %c0_i32, %c0_i32_0 : i32, i32, i32
  }
}

</mosaic_0001>

<bundles_post_ra>
// kernel: tpu_custom_call.1
= control target key start
LH: loop header
LB: loop body
LE: loop exit
PB: predicated region body
PF: predicated region fallthrough
CT: control target
= control target key end

     0   :  { %10 = vsyncpa [#allocation3], 0  ;;  %s1891_s0 = inlined_call_operand.hbm [shape: f32[2,128,256], index: 0, kind: input, shape index: {}]   ;;  %s1892_s1 = inlined_call_operand.vmem [shape: f32[8,128], index: 1, kind: input, shape index: {}]   ;;  %s1893_s2 = inlined_call_operand.vmem [shape: f32[8,1], index: 2, kind: input, shape index: {}]   ;;  %s1894_s3 = inlined_call_operand.vmem [shape: f32[128,8], index: 3, kind: input, shape index: {}]   ;;  %s1895_s4 = inlined_call_operand.vmem [shape: f32[128,1], index: 4, kind: input, shape index: {}]   ;;  %s1896_s5 = inlined_call_operand.hbm [shape: f32[2,128,256], index: 5, kind: output, shape index: {}]  }
   0x1   :  { %12 = vsyncpa [#allocation3 + $0x1], 0 }
   0x2   :  { %13 = vsyncpa [#allocation4], 0 }
   0x3   :  { %15 = vsyncpa [#allocation4 + $0x1], 0  ;;  %s1402_s18 = smov 0   ;;  %s1404_s19 = smov 0  }
   0x4   :  { %s1406_s20 = smov 0   ;;  %s1408_s21 = smov 0  }
   0x5 LB: > { %s1423_s22 = sadd.s32 4294967295, %s1360_s21   ;;  %s972_s23 = sadd.s32 4294967294, %s1360_s21   ;;  %s1360_s21 = sphi %s1408_s21, %s1909_s21   ;;  %s1356_s20 = sphi %s1406_s20, %s1908_s20   ;;  %s1352_s19 = sphi %s1404_s19, %s1907_s19   ;;  %s1348_s18 = sphi %s1402_s18, %s1906_s18  }
   0x6   : > { %s1427_s24 = sadd.s32 1, %s1360_s21   ;;  %s28_s25 = sadd.s32 1, %s1356_s20 }
   0x7   : > { %s25_s26 = ssub.s32 %s1360_s21, %s1427_s24  ;;  %p35_p0 = scmp.ne.s32.totalorder %s1356_s20, %s1352_s19 }
   0x8   : > { %p26_p1 = scmp.eq.s32.totalorder %s25_s26, 0  ;;  %p36_p2 = scmp.eq.s32.totalorder %s1360_s21, 0 }
   0x9   : > { %p41_p3 = scmp.ne.s32.totalorder %s1352_s19, %s1348_s18  ;;  %p42_p4 = scmp.eq.s32.totalorder %s1423_s22, 0 }
   0xa   : > { %s1439_s27 = scalar_select %p26_p1, %s1356_s20, %s28_s25  }
   0xb   : > { %p1441_p5 = por %p36_p2, %p35_p0  ;;  %p1445_p6 = por %p42_p4, %p41_p3 }
   0xc   : > { %p149_p7 = scmp.eq.s32.totalorder %s1423_s22, 1  ;;  %p155_p8 = scmp.eq.s32.totalorder %s972_s23, 1 }
   0xd   : > { %p1152_p10 = scmp.lt.s32.totalorder %s1360_s21, 2  ;;  %s187_s7 = sand.u32 1, %s1356_s20  }
   0xe   : > { %p1452_p11 = por %p149_p7, %p35_p0  ;;  %p1456_p12 = por %p155_p8, %p41_p3 }
   0xf   : > { %s1019_s8 = sshll.u32 %s1360_s21, 12  ;;  %s975_s9 = sshll.u32 %s187_s7, 8 }
  0x10   : > { %s1900_s30 = scalar_select %p1452_p11, 1, 0 }
  0x11   : > { %s1901_s6 = scalar_select %p1456_p12, 1, 0 }
  0x12   : > { %s1465_s12 = scalar_lea.hbm %s1891_s0, %s1019_s8  ;;  %s191_s13 = scalar_lea.vmem [#allocation2], %s975_s9 }
  0x13   : > { %s198_s14 = sshll.u32 %s191_s13, 4  ;;  %p1469_p13 = pnand %p1152_p10, %p1441_p5  ;;  %s1473_s14 = int_to_ptr.vmem [resolvable:$true] %s198_s14 }
  0x14   : > { %s1475_s16 = scalar_lea.sflag [#allocation3], %s187_s7  ;;  %s1264_s17 = scalar_lea.hbm %s1465_s12, 4096 }
  0x15   : > { %p1265_p0 = scmp.ne.s32.totalorder %s1465_s12, %s1264_s17  ;;  %p1266_p1 = pneg %p1469_p13 }
  0x16   : > { %s1269_s26 = scalar_lea.hbm %s1891_s0, 8192  ;;  %p1270_p4 = scmp.lt.u32.totalorder %s1465_s12, %s1891_s0 }
  0x17   : > { %p1267_p2 = pnand %p1266_p1, %p1265_p0  ;;  %p1271_p5 = scmp.lt.u32.totalorder %s1269_s26, %s1264_s17 }
  0x18   : > { %p1273_p8 = scmp.lt.u32.totalorder %s1264_s17, %s1465_s12 }
  0x19   : > { %p1268_p3 = pneg %p1267_p2  ;;  %p1272_p7 = por %p1271_p5, %p1270_p4 }
  0x1b   : > { %p1274_p10 = por %p1273_p8, %p1272_p7 }
  0x1d   : > { %p1275_p9 = pnand %p1274_p10, %p1268_p3 }
  0x1f   : > { %1278 = shalt.err (!%p1275_p9)
}
  0x20   : > { %s1279_s7 = scalar_lea.vmem %s1473_s14, 4096  ;;  %s1362_s9 = smov [#allocation2]  }
  0x21   : > { %p1280_p0 = scmp.ne.s32.totalorder %s1473_s14, %s1279_s7  ;;  %s1284_s10 = sshll.u32 %s1362_s9, 4  ;;  %s1285_s10 = int_to_ptr.vmem [resolvable:$false] %s1284_s10 }
  0x22   : > { %s1286_s11 = scalar_lea.vmem %s1285_s10, 8192  ;;  %p1287_p11 = scmp.lt.s32.totalorder %s1473_s14, %s1285_s10 }
  0x23   : > { %p1282_p2 = pnand %p1280_p0, %p1266_p1  ;;  %p1288_p4 = scmp.lt.s32.totalorder %s1286_s11, %s1279_s7 }
  0x25   : > { %p1283_p12 = pneg %p1282_p2  ;;  %p1289_p5 = por %p1288_p4, %p1287_p11 }
  0x27   : > { %p1290_p7 = pnand %p1289_p5, %p1283_p12 }
  0x29   : > { %1293 = shalt.err (!%p1290_p7)
}
  0x2a   : > { %s1363_s13 = smov 256   ;;  %s1364_s17 = smov 16  }
  0x2b   : > { %1147 = dma.hbm_to_vmem [thread:$0]  (!%p1469_p13), %s1465_s12, 4096, %s1473_s14, %s1475_s16, %s1363_s13, %s1363_s13, %s1364_s17  }
  0x2c   : > { %p978_p9 = scmp.ge.s32.totalorder %s1360_s21, 1  ;;  %p206_p1 = scmp.lt.s32.totalorder %s1360_s21, 3 }
  0x2e   : > { %p207_p3 = pnand %p978_p9, %p206_p1 }
  0x2f   : > { %s1506_s23 = sand.u32 (!%p207_p3), 1, %s1352_s19  }
  0x30   : > { %210 = sbr.rel (%p207_p3) target bundleno = 910 (0x38e), region = 40  ;;  %s979_s25 = sshll.u32 (!%p207_p3), %s1506_s23, 8 }
  0x31   : > { %s213_s26 = scalar_lea.sflag (!%p207_p3), [#allocation3], %s1506_s23  ;;  %s1512_s28 = scalar_lea.vmem (!%p207_p3), [#allocation2], %s979_s25 }
  0x37   : > { %1339 = dma.done.wait (%p1445_p6), %s213_s26, 4096  }
  0x38   : > { %1341 = vsyncadd (%p1445_p6), %s213_s26, 4294963200  ;;  %v1519_v0 = vld [vmem:[%s1512_s28 + $0x20] sm:$0xff]  ;;  %v1522_v1 = vld [vmem:[%s1512_s28 + $0x28] sm:$0xff]  ;;  %v1365_v44 = vmov 0.0|0.0   ;;  %vm1366_vm0 = vmmov 0   ;;  %v1367_v49 = vmov 0.0  }
  0x39   : > { %v1525_v2 = vld [vmem:[%s1512_s28] sm:$0xff]  ;;  %v281_v3 = vadd.f32 %v1522_v1, %v1519_v0  ;;  %v1530_v4 = vld [vmem:[%s1512_s28 + $0x8] sm:$0xff]  ;;  %v1533_v5 = vld [vmem:[%s1512_s28 + $0x30] sm:$0xff]  ;;  %1116 = vmatprep.subr.bf16.mxu0 %v1365_v44  ;;  %1087 = vmatprep.mubr.msk.f32.mxu0 %vm1366_vm0, %v1367_v49  ;;  %vm451_vm1 = vcmask 64512   ;;  %s1778_s26 = scalar_lea.vmem [#allocation5], %s979_s25  ;;  %s1020_s25 = sshll.u32 %s1423_s22, 12 }
  0x3a   : > { %v1536_v6 = vld [vmem:[%s1512_s28 + $0x38] sm:$0xff]  ;;  %v275_v7 = vadd.f32 %v1530_v4, %v1525_v2  ;;  %v1541_v8 = vld [vmem:[%s1512_s28 + $0x10] sm:$0xff]  ;;  %v1557_v14 = vld [vmem:[%s1512_s28 + $0x40] sm:$0xff]  ;;  %s1841_s14 = scalar_lea.hbm %s1896_s5, %s1020_s25  ;;  %s886_s22 = scalar_lea.sflag [#allocation4], %s1506_s23 }
  0x3b   : > { %v1544_v9 = vld [vmem:[%s1512_s28 + $0x18] sm:$0xff]  ;;  %282 = vadd.xlane.f32.xlu1 %v281_v3  ;;  %v284_v10 = vadd.f32 %v1536_v6, %v1533_v5  ;;  %v1551_v12 = vld [vmem:[%s1512_s28 + $0x50] sm:$0xff]  ;;  %v1560_v15 = vld [vmem:[%s1512_s28 + $0x48] sm:$0xff]  ;;  %p1903_p11 = scmp.ne.s32.totalorder %s1900_s30, 0  ;;  %s1369_s16 = smov [#allocation5]  }
  0x3c   : > { %276 = vadd.xlane.f32.xlu0 %v275_v7  ;;  %v278_v11 = vadd.f32 %v1544_v9, %v1541_v8  ;;  %v1554_v13 = vld [vmem:[%s1512_s28 + $0x58] sm:$0xff]  ;;  %v287_v17 = vadd.f32 %v1560_v15, %v1557_v14  ;;  %v1567_v18 = vld [vmem:[%s1512_s28 + $0x70] sm:$0xff]  ;;  %v1573_v20 = vld [vmem:[%s1512_s28 + $0x60] sm:$0xff]  ;;  %s1298_s8 = sshll.u32 %s1369_s16, 4  ;;  %s1299_s8 = int_to_ptr.vmem [resolvable:$false] %s1298_s8 }
  0x3d   : > { %v290_v16 = vadd.f32 %v1554_v13, %v1551_v12  ;;  %v1570_v19 = vld [vmem:[%s1512_s28 + $0x78] sm:$0xff]  ;;  %v1576_v21 = vld [vmem:[%s1512_s28 + $0x68] sm:$0xff]  ;;  %v1583_v24 = vld [vmem:[%s1512_s28 + $0x90] sm:$0xff]  ;;  %s1300_s7 = scalar_lea.vmem %s1299_s8, 8192 }
  0x3e   : > { %v296_v22 = vadd.f32 %v1570_v19, %v1567_v18  ;;  %v293_v23 = vadd.f32 %v1576_v21, %v1573_v20  ;;  %v1586_v25 = vld [vmem:[%s1512_s28 + $0x98] sm:$0xff]  ;;  %v1589_v26 = vld [vmem:[%s1512_s28 + $0x80] sm:$0xff]  ;;  %v1592_v27 = vld [vmem:[%s1512_s28 + $0x88] sm:$0xff] }
  0x3f   : > { %285 = vadd.xlane.f32.xlu1 %v284_v10  ;;  %v302_v28 = vadd.f32 %v1586_v25, %v1583_v24  ;;  %v299_v29 = vadd.f32 %v1592_v27, %v1589_v26  ;;  %v1599_v30 = vld [vmem:[%s1512_s28 + $0xb0] sm:$0xff]  ;;  %v1602_v31 = vld [vmem:[%s1512_s28 + $0xb8] sm:$0xff]  ;;  %v1605_v32 = vld [vmem:[%s1512_s28 + $0xa0] sm:$0xff] }
  0x40   : > { %279 = vadd.xlane.f32.xlu0 %v278_v11  ;;  %v1608_v33 = vld [vmem:[%s1512_s28 + $0xa8] sm:$0xff]  ;;  %v308_v34 = vadd.f32 %v1602_v31, %v1599_v30  ;;  %v1615_v36 = vld [vmem:[%s1512_s28 + $0xd0] sm:$0xff]  ;;  %v1618_v37 = vld [vmem:[%s1512_s28 + $0xd8] sm:$0xff] }
  0x41   : > { %v305_v35 = vadd.f32 %v1608_v33, %v1605_v32  ;;  %v1621_v38 = vld [vmem:[%s1512_s28 + $0xc0] sm:$0xff]  ;;  %v1624_v39 = vld [vmem:[%s1512_s28 + $0xc8] sm:$0xff]  ;;  %v314_v40 = vadd.f32 %v1618_v37, %v1615_v36  ;;  %v1631_v42 = vld [vmem:[%s1512_s28 + $0xf0] sm:$0xff] }
  0x42   : > { %v311_v41 = vadd.f32 %v1624_v39, %v1621_v38  ;;  %v1634_v43 = vld [vmem:[%s1512_s28 + $0xf8] sm:$0xff]  ;;  %v1638_v45 = vld [vmem:[%s1512_s28 + $0xe0] sm:$0xff]  ;;  %v1641_v46 = vld [vmem:[%s1512_s28 + $0xe8] sm:$0xff]  ;;  %s899_s28 = sshll.u32 %s1778_s26, 4  ;;  %s1843_s28 = int_to_ptr.vmem [resolvable:$true] %s899_s28 }
  0x43   : > { %291 = vadd.xlane.f32.xlu1 %v290_v16  ;;  %v320_v47 = vadd.f32 %v1634_v43, %v1631_v42  ;;  %v317_v48 = vadd.f32 %v1641_v46, %v1638_v45  ;;  %s1294_s15 = scalar_lea.vmem %s1843_s28, 4096  ;;  %p1301_p8 = scmp.lt.s32.totalorder %s1843_s28, %s1299_s8 }
  0x44   : > { %288 = vadd.xlane.f32.xlu0 %v287_v17  ;;  %p1295_p6 = scmp.ne.s32.totalorder %s1843_s28, %s1294_s15  ;;  %p1302_p10 = scmp.lt.s32.totalorder %s1300_s7, %s1294_s15 }
  0x46   : > { %p1296_p12 = pnand %p1295_p6, %p1903_p11  ;;  %p1303_p0 = por %p1302_p10, %p1301_p8 }
  0x47   : > { %297 = vadd.xlane.f32.xlu1 %v296_v22 }
  0x48   : > { %294 = vadd.xlane.f32.xlu0 %v293_v23  ;;  %p1297_p13 = pneg %p1296_p12 }
  0x4a   : > { %p1304_p2 = pnand %p1303_p0, %p1297_p13 }
  0x4b   : > { %303 = vadd.xlane.f32.xlu1 %v302_v28 }
  0x4c   : > { %300 = vadd.xlane.f32.xlu0 %v299_v29 }
  0x4f   : > { %309 = vadd.xlane.f32.xlu1 %v308_v34 }
  0x50   : > { %306 = vadd.xlane.f32.xlu0 %v305_v35 }
  0x53   : > { %315 = vadd.xlane.f32.xlu1 %v314_v40 }
  0x54   : > { %312 = vadd.xlane.f32.xlu0 %v311_v41 }
  0x57   : > { %321 = vadd.xlane.f32.xlu1 %v320_v47 }
  0x58   : > { %318 = vadd.xlane.f32.xlu0 %v317_v48 }
  0xc8   : > { %v283_v50 = vpop.xlane.xlu1 %282 }
  0xc9   : > { %v277_v51 = vpop.xlane.xlu0 %276  ;;  %v326_v56 = vmul.f32 0.00390625, %v283_v50 }
  0xca   : > { %v324_v54 = vmul.f32 0.00390625, %v277_v51 }
  0xcc   : > { %v286_v52 = vpop.xlane.xlu1 %285 }
  0xcd   : > { %v280_v53 = vpop.xlane.xlu0 %279  ;;  %v327_v57 = vmul.f32 0.00390625, %v286_v52 }
  0xce   : > { %v325_v55 = vmul.f32 0.00390625, %v280_v53 }
  0xcf   : > { %v1120_v63 = vpack.c.bf16 %v327_v57, %v326_v56 }
  0xd0   : > { %v1117_v58 = vpack.c.bf16 %v325_v55, %v324_v54  ;;  %v292_v59 = vpop.xlane.xlu1 %291 }
  0xd1   : > { %v289_v60 = vpop.xlane.xlu0 %288  ;;  %v329_v61 = vmul.f32 0.00390625, %v292_v59  ;;  %v340_v59 = vld [vmem:[%s1892_s1] sm:$0xff] }
  0xd2   : > { %1118 = vmatpush3.bf16.msra.mxu0 %v1117_v58  ;;  %v328_v62 = vmul.f32 0.00390625, %v289_v60  ;;  %v419_v60 = vld [vmem:[%s1894_s3] sm:$0xff] }
  0xd3   : > { %1119 = vmatprep.subr.bf16.mxu0 %v1365_v44  ;;  %1092 = vmatprep.mubr.msk.f32.mxu1 %vm451_vm1, %v419_v60  ;;  %v438_v60 = vld [vmem:[%s1895_s4 + $0x18] sm:$0xff] }
  0xd4   : > { %v298_v3 = vpop.xlane.xlu1 %297  ;;  %v1123_v10 = vpack.c.bf16 %v329_v61, %v328_v62  ;;  %v341_v61 = vld [vmem:[%s1893_s2] sm:$0xff] }
  0xd5   : > { %v295_v7 = vpop.xlane.xlu0 %294  ;;  %v331_v11 = vmul.f32 0.00390625, %v298_v3 }
  0xd6   : > { %1121 = vmatpush3.bf16.msra.mxu0 %v1120_v63  ;;  %v330_v16 = vmul.f32 0.00390625, %v295_v7 }
  0xd7   : > { %1122 = vmatprep.subr.bf16.mxu0 %v1365_v44 }
  0xd8   : > { %v304_v17 = vpop.xlane.xlu1 %303  ;;  %v1126_v23 = vpack.c.bf16 %v331_v11, %v330_v16 }
  0xd9   : > { %v301_v22 = vpop.xlane.xlu0 %300  ;;  %v333_v28 = vmul.f32 0.00390625, %v304_v17  ;;  %v420_v17 = vld [vmem:[%s1894_s3 + $0x8] sm:$0xff] }
  0xda   : > { %1124 = vmatpush3.bf16.msra.mxu0 %v1123_v10  ;;  %v332_v29 = vmul.f32 0.00390625, %v301_v22  ;;  %v421_v22 = vld [vmem:[%s1894_s3 + $0x10] sm:$0xff] }
  0xdb   : > { %1125 = vmatprep.subr.bf16.mxu0 %v1365_v44 }
  0xdc   : > { %v310_v34 = vpop.xlane.xlu1 %309  ;;  %v1129_v40 = vpack.c.bf16 %v333_v28, %v332_v29  ;;  %v423_v28 = vld [vmem:[%s1894_s3 + $0x20] sm:$0xff]  ;;  %v424_v29 = vld [vmem:[%s1894_s3 + $0x28] sm:$0xff] }
  0xdd   : > { %v307_v35 = vpop.xlane.xlu0 %306  ;;  %v335_v41 = vmul.f32 0.00390625, %v310_v34  ;;  %v425_v34 = vld [vmem:[%s1894_s3 + $0x30] sm:$0xff] }
  0xde   : > { %1127 = vmatpush3.bf16.msra.mxu0 %v1126_v23  ;;  %v334_v47 = vmul.f32 0.00390625, %v307_v35  ;;  %v422_v23 = vld [vmem:[%s1894_s3 + $0x18] sm:$0xff] }
  0xdf   : > { %1128 = vmatprep.subr.bf16.mxu0 %v1365_v44  ;;  %v426_v35 = vld [vmem:[%s1894_s3 + $0x38] sm:$0xff] }
  0xe0   : > { %v316_v48 = vpop.xlane.xlu1 %315  ;;  %v1132_v50 = vpack.c.bf16 %v335_v41, %v334_v47  ;;  %v428_v41 = vld [vmem:[%s1894_s3 + $0x48] sm:$0xff]  ;;  %v429_v47 = vld [vmem:[%s1894_s3 + $0x50] sm:$0xff] }
  0xe1   : > { %v313_v49 = vpop.xlane.xlu0 %312  ;;  %v337_v51 = vmul.f32 0.00390625, %v316_v48  ;;  %v430_v48 = vld [vmem:[%s1894_s3 + $0x58] sm:$0xff] }
  0xe2   : > { %1130 = vmatpush3.bf16.msra.mxu0 %v1129_v40  ;;  %v336_v52 = vmul.f32 0.00390625, %v313_v49  ;;  %v427_v40 = vld [vmem:[%s1894_s3 + $0x40] sm:$0xff] }
  0xe3   : > { %1131 = vmatprep.subr.bf16.mxu0 %v1365_v44  ;;  %v431_v49 = vld [vmem:[%s1894_s3 + $0x60] sm:$0xff] }
  0xe4   : > { %v322_v53 = vpop.xlane.xlu1 %321  ;;  %v1135_v55 = vpack.c.bf16 %v337_v51, %v336_v52  ;;  %v433_v51 = vld [vmem:[%s1894_s3 + $0x70] sm:$0xff]  ;;  %v434_v52 = vld [vmem:[%s1894_s3 + $0x78] sm:$0xff] }
  0xe5   : > { %v319_v54 = vpop.xlane.xlu0 %318  ;;  %v339_v56 = vmul.f32 0.00390625, %v322_v53  ;;  %v1368_v53 = vmov 0  }
  0xe6   : > { %1133 = vmatpush3.bf16.msra.mxu0 %v1132_v50  ;;  %v338_v57 = vmul.f32 0.00390625, %v319_v54  ;;  %v432_v50 = vld [vmem:[%s1894_s3 + $0x68] sm:$0xff]  ;;  %1194 = vset.pattern.permute.xlu1 %v1368_v53 }
  0xe7   : > { %1134 = vmatprep.subr.bf16.mxu0 %v1365_v44  ;;  %1195 = vset.pattern.permute.xlu0 %v1368_v53  ;;  %v436_v54 = vld [vmem:[%s1895_s4 + $0x8] sm:$0xff] }
  0xe8   : > { %v1138_v58 = vpack.c.bf16 %v339_v56, %v338_v57 }
  0xea   : > { %1136 = vmatpush3.bf16.msra.mxu0 %v1135_v55  ;;  %v435_v55 = vld [vmem:[%s1895_s4] sm:$0xff] }
  0xeb   : > { %1137 = vmatprep.subr.bf16.mxu0 %v1365_v44 }
  0xee   : > { %1139 = vmatpush3.bf16.msra.mxu0 %v1138_v58 }
  0xf1   : > { %1088 = vmatmul.mubr.f32.vlgmr.msra.gmra.mrb[0].mxu0 %v340_v59 }
 0x1c4   : > { %v408_v62 = vpop.f32.mrb[0].mxu0 }
 0x1c5   : > { %v409_v63 = vadd.f32 %v408_v62, %v341_v61  ;;  %v1089_v44 = vpop.f32.mrb[1].mxu0  ;;  %v437_v62 = vld [vmem:[%s1895_s4 + $0x10] sm:$0xff] }
 0x1c7   : > { %v981_v3 = vmul.f32 -1.442695, %v409_v63 }
 0x1c9   : > { %1196 = vpow2.f32 %v981_v3 }
 0x1d3   : > { %v1197_v7 = vpop.eup %1196 }
 0x1d4   : > { %v415_v10 = vadd.f32 1.0, %v1197_v7 }
 0x1d6   : > { %1198 = vrcp.f32 %v415_v10 }
 0x1e0   : > { %v1199_v11 = vpop.eup %1198 }
 0x1e1   : > { %v418_v16 = vmul.f32 %v1199_v11, %v409_v63  ;;  %v440_v11 = vld [vmem:[%s1895_s4 + $0x28] sm:$0xff] }
 0x1e3   : > { %1090 = vmatprep.subr.mxu1 %v418_v16 }
 0x1e4   : > { %1091 = vmatpush3.msra.mxu1 %v418_v16 }
 0x1e5   : > { %1093 = vmatmul.mubr.msk.f32.vlgmr.msra.gmra.mrb[0].mxu1 %vm451_vm1, %v420_v17  ;;  %v439_v17 = vld [vmem:[%s1895_s4 + $0x20] sm:$0xff] }
 0x1e6   : > { %1095 = vmatprep.mubr.msk.f32.mxu1 %vm451_vm1, %v421_v22 }
 0x1e9   : > { %1096 = vmatmul.mubr.msk.f32.gmra.mrb[2].mxu1 %vm451_vm1, %v422_v23 }
 0x1ea   : > { %1098 = vmatprep.mubr.msk.f32.mxu1 %vm451_vm1, %v423_v28 }
 0x1ed   : > { %1099 = vmatmul.mubr.msk.f32.gmra.mrb[4].mxu1 %vm451_vm1, %v424_v29 }
 0x1ee   : > { %1101 = vmatprep.mubr.msk.f32.mxu1 %vm451_vm1, %v425_v34 }
 0x1f1   : > { %1102 = vmatmul.mubr.msk.f32.gmra.mrb[6].mxu1 %vm451_vm1, %v426_v35  ;;  %v442_v35 = vld [vmem:[%s1895_s4 + $0x38] sm:$0xff] }
 0x1f2   : > { %1104 = vmatprep.mubr.msk.f32.mxu1 %vm451_vm1, %v427_v40 }
 0x1f5   : > { %1105 = vmatmul.mubr.msk.f32.gmra.mrb[8].mxu1 %vm451_vm1, %v428_v41 }
 0x1f6   : > { %1107 = vmatprep.mubr.msk.f32.mxu1 %vm451_vm1, %v429_v47 }
 0x1f9   : > { %1108 = vmatmul.mubr.msk.f32.gmra.mrb[10].mxu1 %vm451_vm1, %v430_v48 }
 0x1fa   : > { %1110 = vmatprep.mubr.msk.f32.mxu1 %vm451_vm1, %v431_v49 }
 0x1fd   : > { %1111 = vmatmul.mubr.msk.f32.gmra.mrb[12].mxu1 %vm451_vm1, %v432_v50  ;;  %v441_v50 = vld [vmem:[%s1895_s4 + $0x30] sm:$0xff] }
 0x1fe   : > { %1113 = vmatprep.mubr.msk.f32.mxu1 %vm451_vm1, %v433_v51  ;;  %v444_v51 = vld [vmem:[%s1895_s4 + $0x48] sm:$0xff] }
 0x201   : > { %1114 = vmatmul.mubr.msk.f32.gmra.mrb[14].mxu1 %vm451_vm1, %v434_v52 }
 0x2b8   : > { %v1094_v56 = vpop.f32.mrb[0].mxu1 }
 0x2b9   : > { %v572_v57 = vadd.f32 %v1094_v56, %v436_v54  ;;  %v566_v58 = vpop.f32.mrb[1].mxu1 }
 0x2ba   : > { %v567_v59 = vadd.f32 %v566_v58, %v435_v55  ;;  %v443_v58 = vld [vmem:[%s1895_s4 + $0x40] sm:$0xff] }
 0x2bb   : > { %v999_v61 = vmul.f32 -1.442695, %v572_v57 }
 0x2bc   : > { %v998_v63 = vmul.f32 -1.442695, %v567_v59  ;;  %v1097_v44 = vpop.f32.mrb[2].mxu1 }
 0x2bd   : > { %1200 = vpow2.f32 %v999_v61  ;;  %v582_v3 = vadd.f32 %v1097_v44, %v438_v60  ;;  %v576_v7 = vpop.f32.mrb[3].mxu1 }
 0x2be   : > { %1202 = vpow2.f32 %v998_v63  ;;  %v577_v10 = vadd.f32 %v576_v7, %v437_v62  ;;  %v446_v62 = vld [vmem:[%s1895_s4 + $0x58] sm:$0xff]  ;;  %v445_v7 = vld [vmem:[%s1895_s4 + $0x50] sm:$0xff] }
 0x2bf   : > { %v1001_v16 = vmul.f32 -1.442695, %v582_v3 }
 0x2c0   : > { %v1000_v22 = vmul.f32 -1.442695, %v577_v10  ;;  %v1100_v23 = vpop.f32.mrb[4].mxu1 }
 0x2c1   : > { %1204 = vpow2.f32 %v1001_v16  ;;  %v592_v28 = vadd.f32 %v1100_v23, %v440_v11  ;;  %v586_v29 = vpop.f32.mrb[5].mxu1 }
 0x2c2   : > { %1206 = vpow2.f32 %v1000_v22  ;;  %v587_v34 = vadd.f32 %v586_v29, %v439_v17 }
 0x2c3   : > { %v1003_v40 = vmul.f32 -1.442695, %v592_v28 }
 0x2c4   : > { %v1002_v41 = vmul.f32 -1.442695, %v587_v34  ;;  %v1103_v47 = vpop.f32.mrb[6].mxu1  ;;  %v448_v34 = vld [vmem:[%s1895_s4 + $0x68] sm:$0xff] }
 0x2c5   : > { %1208 = vpow2.f32 %v1003_v40  ;;  %v602_v48 = vadd.f32 %v1103_v47, %v442_v35  ;;  %v596_v49 = vpop.f32.mrb[7].mxu1  ;;  %v447_v47 = vld [vmem:[%s1895_s4 + $0x60] sm:$0xff] }
 0x2c6   : > { %1210 = vpow2.f32 %v1002_v41  ;;  %v597_v56 = vadd.f32 %v596_v49, %v441_v50 }
 0x2c7   : > { %v1201_v52 = vpop.eup %1200  ;;  %v1005_v53 = vmul.f32 -1.442695, %v602_v48 }
 0x2c8   : > { %v1203_v54 = vpop.eup %1202  ;;  %v694_v55 = vadd.f32 1.0, %v1201_v52  ;;  %v1106_v57 = vpop.f32.mrb[8].mxu1  ;;  %v1004_v16 = vmul.f32 -1.442695, %v597_v56 }
 0x2c9   : > { %v693_v59 = vadd.f32 1.0, %v1203_v54  ;;  %1212 = vpow2.f32 %v1005_v53  ;;  %v612_v60 = vadd.f32 %v1106_v57, %v444_v51  ;;  %v606_v61 = vpop.f32.mrb[9].mxu1 }
 0x2ca   : > { %1214 = vrcp.f32 %v694_v55  ;;  %v607_v3 = vadd.f32 %v606_v61, %v443_v58  ;;  %v450_v55 = vld [vmem:[%s1895_s4 + $0x78] sm:$0xff]  ;;  %v449_v61 = vld [vmem:[%s1895_s4 + $0x70] sm:$0xff] }
 0x2cb   : > { %v1205_v63 = vpop.eup %1204  ;;  %1216 = vrcp.f32 %v693_v59  ;;  %v1007_v44 = vmul.f32 -1.442695, %v612_v60 }
 0x2cc   : > { %v1207_v10 = vpop.eup %1206  ;;  %v696_v11 = vadd.f32 1.0, %v1205_v63  ;;  %v1109_v17 = vpop.f32.mrb[10].mxu1  ;;  %v1006_v40 = vmul.f32 -1.442695, %v607_v3 }
 0x2cd   : > { %1218 = vpow2.f32 %v1007_v44  ;;  %v622_v22 = vadd.f32 %v1109_v17, %v446_v62  ;;  %v616_v23 = vpop.f32.mrb[11].mxu1  ;;  %v695_v28 = vadd.f32 1.0, %v1207_v10 }
 0x2ce   : > { %1220 = vrcp.f32 %v696_v11  ;;  %v617_v29 = vadd.f32 %v616_v23, %v445_v7 }
 0x2cf   : > { %v1209_v35 = vpop.eup %1208  ;;  %v1009_v41 = vmul.f32 -1.442695, %v622_v22  ;;  %1222 = vpow2.f32 %v1004_v16 }
 0x2d0   : > { %v698_v48 = vadd.f32 1.0, %v1209_v35  ;;  %v1112_v49 = vpop.f32.mrb[12].mxu1  ;;  %v1211_v50 = vpop.eup %1210  ;;  %v1008_v53 = vmul.f32 -1.442695, %v617_v29 }
 0x2d1   : > { %1224 = vpow2.f32 %v1009_v41  ;;  %v632_v51 = vadd.f32 %v1112_v49, %v448_v34  ;;  %v626_v52 = vpop.f32.mrb[13].mxu1  ;;  %v697_v59 = vadd.f32 1.0, %v1211_v50 }
 0x2d2   : > { %1226 = vrcp.f32 %v695_v28  ;;  %v627_v54 = vadd.f32 %v626_v52, %v447_v47 }
 0x2d3   : > { %v1213_v56 = vpop.eup %1212  ;;  %1228 = vpow2.f32 %v1006_v40  ;;  %v1011_v57 = vmul.f32 -1.442695, %v632_v51 }
 0x2d4   : > { %v1215_v58 = vpop.eup %1214  ;;  %1230 = vrcp.f32 %v698_v48  ;;  %v1115_v60 = vpop.f32.mrb[14].mxu1  ;;  %v1010_v63 = vmul.f32 -1.442695, %v627_v54  ;;  %v700_v17 = vadd.f32 1.0, %v1213_v56 }
 0x2d5   : > { %v1217_v62 = vpop.eup %1216  ;;  %1232 = vpow2.f32 %v1011_v57  ;;  %v642_v44 = vadd.f32 %v1115_v60, %v450_v55  ;;  %748 = vperm.xlu1 %1194, %v1215_v58   ;;  %v636_v3 = vpop.f32.mrb[15].mxu1 }
 0x2d6   : > { %1234 = vpow2.f32 %v1008_v53  ;;  %743 = vperm.xlu0 %1195, %v1217_v62   ;;  %v637_v11 = vadd.f32 %v636_v3, %v449_v61 }
 0x2d7   : > { %v1219_v7 = vpop.eup %1218  ;;  %v1013_v10 = vmul.f32 -1.442695, %v642_v44  ;;  %1236 = vrcp.f32 %v697_v59 }
 0x2d8   : > { %v1221_v16 = vpop.eup %1220  ;;  %v702_v22 = vadd.f32 1.0, %v1219_v7  ;;  %1238 = vpow2.f32 %v1010_v63  ;;  %v1012_v29 = vmul.f32 -1.442695, %v637_v11 }
 0x2d9   : > { %758 = vperm.xlu1 %1194, %v1221_v16   ;;  %v1223_v23 = vpop.eup %1222 }
 0x2da   : > { %1240 = vrcp.f32 %v702_v22  ;;  %v699_v41 = vadd.f32 1.0, %v1223_v23 }
 0x2db   : > { %v1225_v28 = vpop.eup %1224  ;;  %1242 = vpow2.f32 %v1013_v10 }
 0x2dc   : > { %v1227_v34 = vpop.eup %1226  ;;  %1244 = vrcp.f32 %v700_v17  ;;  %v704_v35 = vadd.f32 1.0, %v1225_v28 }
 0x2dd   : > { %v1229_v40 = vpop.eup %1228  ;;  %753 = vperm.xlu1 %1194, %v1227_v34  }
 0x2de   : > { %v1231_v47 = vpop.eup %1230  ;;  %1246 = vrcp.f32 %v704_v35  ;;  %v701_v50 = vadd.f32 1.0, %v1229_v40 }
 0x2df   : > { %v1233_v48 = vpop.eup %1232  ;;  %1248 = vpow2.f32 %v1012_v29 }
 0x2e0   : > { %v1235_v49 = vpop.eup %1234  ;;  %v706_v51 = vadd.f32 1.0, %v1233_v48  ;;  %1250 = vrcp.f32 %v699_v41 }
 0x2e1   : > { %768 = vperm.xlu1 %1194, %v1231_v47   ;;  %v1237_v52 = vpop.eup %1236  ;;  %v703_v54 = vadd.f32 1.0, %v1235_v49 }
 0x2e2   : > { %1252 = vrcp.f32 %v706_v51  ;;  %v1239_v53 = vpop.eup %1238 }
 0x2e3   : > { %1254 = vrcp.f32 %v701_v50  ;;  %v705_v60 = vadd.f32 1.0, %v1239_v53 }
 0x2e4   : > { %v1241_v55 = vpop.eup %1240  ;;  %1256 = vrcp.f32 %v703_v54 }
 0x2e5   : > { %v1243_v56 = vpop.eup %1242  ;;  %763 = vperm.xlu1 %1194, %v1237_v52   ;;  %788 = vperm.xlu0 %1195, %v1241_v55  }
 0x2e6   : > { %v1245_v57 = vpop.eup %1244  ;;  %v708_v58 = vadd.f32 1.0, %v1243_v56 }
 0x2e8   : > { %v1247_v59 = vpop.eup %1246  ;;  %1258 = vrcp.f32 %v708_v58 }
 0x2e9   : > { %v1249_v61 = vpop.eup %1248  ;;  %778 = vperm.xlu1 %1194, %v1245_v57   ;;  %798 = vperm.xlu0 %1195, %v1247_v59   ;;  %1260 = vrcp.f32 %v705_v60 }
 0x2ea   : > { %v1251_v62 = vpop.eup %1250  ;;  %v707_v44 = vadd.f32 1.0, %v1249_v61 }
 0x2ec   : > { %v1253_v63 = vpop.eup %1252  ;;  %1262 = vrcp.f32 %v707_v44 }
 0x2ed   : > { %773 = vperm.xlu1 %1194, %v1251_v62   ;;  %808 = vperm.xlu0 %1195, %v1253_v63   ;;  %v1255_v3 = vpop.eup %1254 }
 0x2ee   : > { %v1257_v7 = vpop.eup %1256 }
 0x2f1   : > { %783 = vperm.xlu1 %1194, %v1255_v3  }
 0x2f2   : > { %v1259_v10 = vpop.eup %1258 }
 0x2f3   : > { %818 = vperm.xlu0 %1195, %v1259_v10   ;;  %v1261_v11 = vpop.eup %1260 }
 0x2f5   : > { %793 = vperm.xlu1 %1194, %v1257_v7  }
 0x2f6   : > { %v1263_v16 = vpop.eup %1262 }
 0x2f9   : > { %803 = vperm.xlu1 %1194, %v1261_v11  }
 0x2fd   : > { %813 = vperm.xlu1 %1194, %v1263_v16  }
 0x354   : > { %v749_v17 = vpop.permute.xlu1 %748 }
 0x355   : > { %v823_v22 = vmul.f32 %v749_v17, %v1541_v8  ;;  %v824_v23 = vmul.f32 %v749_v17, %v1544_v9  ;;  %v744_v28 = vpop.permute.xlu0 %743 }
 0x356   : > { %v821_v29 = vmul.f32 %v744_v28, %v1525_v2  ;;  %v822_v34 = vmul.f32 %v744_v28, %v1530_v4 }
 0x357   : > { %855 = vst [vmem:[%s1778_s26 + $0x10] sm:$0xff] %v823_v22  ;;  %856 = vst [vmem:[%s1778_s26 + $0x18] sm:$0xff] %v824_v23 }
 0x358   : > { %853 = vst [vmem:[%s1778_s26] sm:$0xff] %v821_v29  ;;  %854 = vst [vmem:[%s1778_s26 + $0x8] sm:$0xff] %v822_v34  ;;  %v759_v2 = vpop.permute.xlu1 %758 }
 0x359   : > { %v827_v4 = vmul.f32 %v759_v2, %v1533_v5  ;;  %v828_v8 = vmul.f32 %v759_v2, %v1536_v6 }
 0x35b   : > { %859 = vst [vmem:[%s1778_s26 + $0x30] sm:$0xff] %v827_v4  ;;  %860 = vst [vmem:[%s1778_s26 + $0x38] sm:$0xff] %v828_v8 }
 0x35c   : > { %v754_v9 = vpop.permute.xlu1 %753 }
 0x35d   : > { %v825_v35 = vmul.f32 %v754_v9, %v1519_v0  ;;  %v826_v40 = vmul.f32 %v754_v9, %v1522_v1 }
 0x35f   : > { %857 = vst [vmem:[%s1778_s26 + $0x20] sm:$0xff] %v825_v35  ;;  %858 = vst [vmem:[%s1778_s26 + $0x28] sm:$0xff] %v826_v40 }
 0x360   : > { %v769_v41 = vpop.permute.xlu1 %768 }
 0x361   : > { %v831_v47 = vmul.f32 %v769_v41, %v1551_v12  ;;  %v832_v5 = vmul.f32 %v769_v41, %v1554_v13 }
 0x363   : > { %863 = vst [vmem:[%s1778_s26 + $0x50] sm:$0xff] %v831_v47  ;;  %864 = vst [vmem:[%s1778_s26 + $0x58] sm:$0xff] %v832_v5 }
 0x364   : > { %v764_v6 = vpop.permute.xlu1 %763  ;;  %v789_v48 = vpop.permute.xlu0 %788 }
 0x365   : > { %v829_v0 = vmul.f32 %v764_v6, %v1557_v14  ;;  %v830_v1 = vmul.f32 %v764_v6, %v1560_v15  ;;  %v839_v49 = vmul.f32 %v789_v48, %v1583_v24  ;;  %v840_v50 = vmul.f32 %v789_v48, %v1586_v25 }
 0x367   : > { %861 = vst [vmem:[%s1778_s26 + $0x40] sm:$0xff] %v829_v0  ;;  %862 = vst [vmem:[%s1778_s26 + $0x48] sm:$0xff] %v830_v1 }
 0x368   : > { %871 = vst [vmem:[%s1778_s26 + $0x90] sm:$0xff] %v839_v49  ;;  %872 = vst [vmem:[%s1778_s26 + $0x98] sm:$0xff] %v840_v50  ;;  %v779_v12 = vpop.permute.xlu1 %778  ;;  %v799_v13 = vpop.permute.xlu0 %798 }
 0x369   : > { %v835_v51 = vmul.f32 %v779_v12, %v1567_v18  ;;  %v836_v14 = vmul.f32 %v779_v12, %v1570_v19  ;;  %v843_v15 = vmul.f32 %v799_v13, %v1599_v30  ;;  %v844_v24 = vmul.f32 %v799_v13, %v1602_v31 }
 0x36b   : > { %867 = vst [vmem:[%s1778_s26 + $0x70] sm:$0xff] %v835_v51  ;;  %868 = vst [vmem:[%s1778_s26 + $0x78] sm:$0xff] %v836_v14 }
 0x36c   : > { %875 = vst [vmem:[%s1778_s26 + $0xb0] sm:$0xff] %v843_v15  ;;  %876 = vst [vmem:[%s1778_s26 + $0xb8] sm:$0xff] %v844_v24  ;;  %v774_v25 = vpop.permute.xlu1 %773  ;;  %v809_v52 = vpop.permute.xlu0 %808 }
 0x36d   : > { %v833_v53 = vmul.f32 %v774_v25, %v1573_v20  ;;  %v834_v18 = vmul.f32 %v774_v25, %v1576_v21  ;;  %v847_v19 = vmul.f32 %v809_v52, %v1615_v36  ;;  %v848_v30 = vmul.f32 %v809_v52, %v1618_v37 }
 0x36f   : > { %865 = vst [vmem:[%s1778_s26 + $0x60] sm:$0xff] %v833_v53  ;;  %866 = vst [vmem:[%s1778_s26 + $0x68] sm:$0xff] %v834_v18 }
 0x370   : > { %879 = vst [vmem:[%s1778_s26 + $0xd0] sm:$0xff] %v847_v19  ;;  %880 = vst [vmem:[%s1778_s26 + $0xd8] sm:$0xff] %v848_v30  ;;  %v784_v31 = vpop.permute.xlu1 %783 }
 0x371   : > { %v837_v54 = vmul.f32 %v784_v31, %v1589_v26  ;;  %v838_v55 = vmul.f32 %v784_v31, %v1592_v27 }
 0x372   : > { %v819_v20 = vpop.permute.xlu0 %818 }
 0x373   : > { %869 = vst [vmem:[%s1778_s26 + $0x80] sm:$0xff] %v837_v54  ;;  %870 = vst [vmem:[%s1778_s26 + $0x88] sm:$0xff] %v838_v55  ;;  %v851_v21 = vmul.f32 %v819_v20, %v1631_v42  ;;  %v852_v36 = vmul.f32 %v819_v20, %v1634_v43 }
 0x374   : > { %v794_v37 = vpop.permute.xlu1 %793 }
 0x375   : > { %883 = vst [vmem:[%s1778_s26 + $0xf0] sm:$0xff] %v851_v21  ;;  %884 = vst [vmem:[%s1778_s26 + $0xf8] sm:$0xff] %v852_v36  ;;  %v841_v56 = vmul.f32 %v794_v37, %v1605_v32  ;;  %v842_v26 = vmul.f32 %v794_v37, %v1608_v33 }
 0x377   : > { %873 = vst [vmem:[%s1778_s26 + $0xa0] sm:$0xff] %v841_v56  ;;  %874 = vst [vmem:[%s1778_s26 + $0xa8] sm:$0xff] %v842_v26 }
 0x378   : > { %v804_v27 = vpop.permute.xlu1 %803 }
 0x379   : > { %v845_v57 = vmul.f32 %v804_v27, %v1621_v38  ;;  %v846_v42 = vmul.f32 %v804_v27, %v1624_v39 }
 0x37b   : > { %877 = vst [vmem:[%s1778_s26 + $0xc0] sm:$0xff] %v845_v57  ;;  %878 = vst [vmem:[%s1778_s26 + $0xc8] sm:$0xff] %v846_v42 }
 0x37c   : > { %v814_v43 = vpop.permute.xlu1 %813 }
 0x37d   : > { %v849_v32 = vmul.f32 %v814_v43, %v1638_v45  ;;  %v850_v33 = vmul.f32 %v814_v43, %v1641_v46 }
 0x37f   : > { %881 = vst [vmem:[%s1778_s26 + $0xe0] sm:$0xff] %v849_v32  ;;  %882 = vst [vmem:[%s1778_s26 + $0xe8] sm:$0xff] %v850_v33 }
 0x380   : > { %1307 = shalt.err (!%p1304_p2)
}
 0x381   : > { %s1308_s9 = scalar_lea.hbm %s1841_s14, 4096  ;;  %s1312_s13 = scalar_lea.hbm %s1896_s5, 8192 }
 0x382   : > { %p1309_p4 = scmp.ne.s32.totalorder %s1841_s14, %s1308_s9  ;;  %p1313_p9 = scmp.lt.u32.totalorder %s1841_s14, %s1896_s5 }
 0x383   : > { %p1314_p1 = scmp.lt.u32.totalorder %s1312_s13, %s1308_s9  ;;  %p1316_p6 = scmp.lt.u32.totalorder %s1308_s9, %s1841_s14 }
 0x384   : > { %p1310_p5 = pnand %p1309_p4, %p1903_p11 }
 0x385   : > { %p1315_p3 = por %p1314_p1, %p1313_p9 }
 0x386   : > { %p1311_p7 = pneg %p1310_p5 }
 0x387   : > { %p1317_p12 = por %p1316_p6, %p1315_p3 }
 0x389   : > { %p1318_p13 = pnand %p1317_p12, %p1311_p7 }
 0x38b   : > { %1321 = shalt.err (!%p1318_p13)
}
 0x38c   : > { %s1370_s25 = smov 256   ;;  %s1371_s29 = smov 16  }
 0x38d   : > { %1142 = dma.vmem_to_hbm [thread:$0]  (%p1903_p11), %s1843_s28, 4096, %s1841_s14, %s886_s22, %s1370_s25, %s1370_s25, %s1371_s29  }
 0x38e PF: > { %s914_s12 = sand.u32 1, %s1348_s18   ;;  %p1904_p8 = scmp.ne.s32.totalorder %s1901_s6, 0 }
 0x38f   : > { %p1905_p10 = scmp.ge.s32.totalorder %s1360_s21, 2  ;;  %s915_s15 = scalar_lea.sflag [#allocation4], %s914_s12 }
 0x391   : > { %p1149_p0 = pnand %p1905_p10, %p1904_p8 }
 0x393   : > { %1343 = dma.done.wait (!%p1149_p0), %s915_s15, 4096  }
 0x394   : > { %1345 = vsyncadd (!%p1149_p0), %s915_s15, 4294963200  ;;  %p18_p2 = scmp.ge.s32.totalorder %s1427_s24, 4   ;;  %s1906_s18 = smov %s1352_s19 }
 0x395   : > { %s1907_s19 = smov %s1356_s20  ;;  %s1908_s20 = smov %s1439_s27 }
 0x396   : > { %s1909_s21 = smov %s1427_s24  ;;  %20 = sbr.rel (!%p18_p2) target bundleno = 5 (0x5), region = 85 }
 0x39d   :  { %920 = vsyncpa [#allocation3], 1 }
 0x39e   :  { %922 = vsyncpa [#allocation3 + $0x1], 1 }
 0x39f   :  { %923 = vsyncpa [#allocation4], 1 }
 0x3a0   :  { %925 = vsyncpa [#allocation4 + $0x1], 1 }

</bundles_post_ra>
